<compile_context>
chip_gen: v7x
topology: tpu7x:2x2x1
jax: 0.10.0
libtpu: 0.0.40
codegen_flags: <defaults>
</compile_context>

<pallas_src>
import functools

import jax
import jax.numpy as jnp
from jax.experimental import pallas as pl
from jax.experimental.pallas import tpu as pltpu


def _apply_activation(y, activation):
    if activation == 'tanh':
        return jnp.tanh(y)
    if activation == 'relu':
        return jnp.maximum(y, 0.0)
    if activation == 'sigmoid':
        return jax.nn.sigmoid(y)
    raise ValueError(f"unknown activation: {activation}")


def _fused_mlp_kernel(*refs, num_layers, activation, matmul_dtype):
    """Fused multi-layer (linear + bias + activation) on one row tile.

    refs = (x_ref, w0_ref, b0_ref, w1_ref, b1_ref, ..., o_ref)
    The intermediate activation `h` stays on-chip (VMEM/vregs) between layers.
    """
    x_ref = refs[0]
    o_ref = refs[-1]

    # Feed the input tile to the first matmul in its native dtype; accumulation
    # is f32 via preferred_element_type, so no f32 up-cast round trip is needed.
    h = x_ref[...]
    for l in range(num_layers):
        w = refs[1 + 2 * l][...]   # already in matmul_dtype (pre-cast in wrapper)
        b = refs[2 + 2 * l][...]   # f32
        lhs = h if h.dtype == matmul_dtype else h.astype(matmul_dtype)
        y = jnp.dot(lhs, w, preferred_element_type=jnp.float32)
        # Bias + activation in f32 on the VPU/EUP (v5e has no bf16 VPU/EUP).
        # TODO(synk): on v6e/v7x a bf16 activation path would halve EUP work.
        h = _apply_activation(y + b, activation)
    o_ref[...] = h.astype(o_ref.dtype)


def _round_up(a, m):
    return ((a + m - 1) // m) * m


def _physical_vmem_bytes():
    try:
        return int(pltpu.get_tpu_info().vmem_capacity_bytes)
    except Exception:
        return 64 * 1024 * 1024   # conservative fallback (v7x per-TC VMEM)


def mlp_forward(x, params, *, activation='tanh', matmul_dtype=None,
                out_dtype=None, tm_max=2048):
    """Fused MLP forward: one pallas_call for all layers.

    x:      (M, K) activations
    params: list of (W, b) with W: (in, out), b: (1, out)
    """
    M, K = x.shape
    dims = [K]
    for w, b in params:
        assert w.shape[0] == dims[-1], "layer input dim mismatch"
        assert b.shape == (1, w.shape[1]), "bias shape mismatch"
        dims.append(w.shape[1])
    n_out = dims[-1]

    mm_dtype = jnp.dtype(x.dtype if matmul_dtype is None else matmul_dtype)
    out_dtype = jnp.dtype(x.dtype if out_dtype is None else out_dtype)

    # Pre-cast weights to the matmul dtype once (resident copy + one-time DMA
    # at matmul precision, no per-grid-step casts). Bias stays f32.
    weights = [w.astype(mm_dtype) for w, _ in params]
    biases = [b.astype(jnp.float32) for _, b in params]

    in_isize = jnp.dtype(x.dtype).itemsize
    out_isize = out_dtype.itemsize
    # Pallas double-buffers every input by default — including the
    # constant-index weight/bias blocks — so count them 2x.
    resident_bytes = 2 * sum(w.size * w.dtype.itemsize for w in weights)
    resident_bytes += 2 * sum(b.size * 4 for b in biases)

    vmem_cap = int(0.85 * _physical_vmem_bytes())

    def footprint(tm):
        tiles = 2 * tm * (K * in_isize + n_out * out_isize)  # in/out double-buffered
        inter = 2 * tm * max(dims) * 4                       # f32 intermediates (rough)
        return resident_bytes + tiles + inter

    # Row tile: sized purely for DMA amortisation (per-grid-step overhead is
    # ~0.35 us), shrunk only if the footprint would not fit scoped VMEM.
    tm_cap = max(8, tm_max)
    while tm_cap > 8 and footprint(tm_cap) > 0.6 * vmem_cap:
        tm_cap //= 2

    if M <= tm_cap:
        tm = M                       # single full-extent block, no pipelining
        n_blocks = 1
    else:
        n_blocks = pl.cdiv(M, tm_cap)
        if n_blocks % 2:             # even block count keeps both v7x TCs busy
            n_blocks += 1
        tm = _round_up(pl.cdiv(M, n_blocks), 8)   # balanced blocks, small tail pad
        n_blocks = pl.cdiv(M, tm)
    grid = (n_blocks,)

    in_specs = [pl.BlockSpec((tm, K), lambda i: (i, 0))]
    flat_inputs = [x]
    for w, b in zip(weights, biases):
        kin, nout = w.shape
        # Full-array blocks with a constant block index: DMA'd once,
        # VMEM-resident across all row tiles.
        in_specs.append(pl.BlockSpec((kin, nout), lambda i: (0, 0)))
        in_specs.append(pl.BlockSpec((1, nout), lambda i: (0, 0)))
        flat_inputs += [w, b]

    out_specs = pl.BlockSpec((tm, n_out), lambda i: (i, 0))

    kernel = functools.partial(
        _fused_mlp_kernel,
        num_layers=len(params),
        activation=activation,
        matmul_dtype=mm_dtype,
    )

    # Always set the scoped-VMEM limit (v5e default is only ~16 MiB) and clamp
    # it to ~85% of this generation's physical VMEM (64 MiB/TC on v7x).
    vmem_limit = min(vmem_cap, max(32 * 1024 * 1024, int(1.25 * footprint(tm))))

    flops = 2 * M * sum(ki * no for ki, no in zip(dims[:-1], dims[1:]))
    transcendentals = (M * sum(dims[1:])) if activation in ('tanh', 'sigmoid') else 0
    bytes_accessed = (M * (K * in_isize + n_out * out_isize)
                      + sum(w.size * w.dtype.itemsize for w in weights)
                      + sum(b.size * 4 for b in biases))

    return pl.pallas_call(
        kernel,
        out_shape=jax.ShapeDtypeStruct((M, n_out), out_dtype),
        grid=grid,
        in_specs=in_specs,
        out_specs=out_specs,
        compiler_params=pltpu.CompilerParams(
            dimension_semantics=("parallel",),
            vmem_limit_bytes=vmem_limit,
        ),
        cost_estimate=pl.CostEstimate(
            flops=int(flops),
            transcendentals=int(transcendentals),
            bytes_accessed=int(bytes_accessed),
        ),
    )(*flat_inputs)


class MLPPallas:
    """Pallas port of the PyTorch MLP (default norm_type=None path)."""
    # TODO(synk): norm_type='group_norm' branch (nn.GroupNorm) not implemented;
    # the default module configuration never constructs norm layers.

    def __init__(self, input_dim, hidden_dims=(128, 128), activation='tanh',
                 matmul_dtype=None, key=None):
        self.activation = activation
        self.matmul_dtype = matmul_dtype  # e.g. jnp.bfloat16 for half MXU/DMA cost
        self.out_dim = hidden_dims[-1]
        self.params = []
        last = input_dim
        key = key if key is not None else jax.random.PRNGKey(0)
        for nh in hidden_dims:
            key, kw, kb = jax.random.split(key, 3)
            # Deterministic init mirroring nn.Linear's U(-1/sqrt(in), 1/sqrt(in)),
            # stored pre-transposed as (in, out).
            bound = 1.0 / (last ** 0.5)
            w = jax.random.uniform(kw, (last, nh), jnp.float32, -bound, bound)
            b = jax.random.uniform(kb, (1, nh), jnp.float32, -bound, bound)
            self.params.append((w, b))
            last = nh

    def __call__(self, x, out_dtype=None):
        return mlp_forward(x, self.params, activation=self.activation,
                           matmul_dtype=self.matmul_dtype, out_dtype=out_dtype)

    def reference(self, x):
        """Plain-JAX f32 reference for correctness checking."""
        x = x.astype(jnp.float32)
        for w, b in self.params:
            x = _apply_activation(x @ w + b, self.activation)
        return x


if __name__ == "__main__":
    key = jax.random.PRNGKey(0)
    k_x, k_x2, k_x3, k_p = jax.random.split(key, 4)

    batch, input_dim = 8, 32
    hidden_dims = (128, 128)

    mlp = MLPPallas(input_dim, hidden_dims=hidden_dims, activation='tanh',
                    key=k_p)

    # 1) Small-batch path: grid=(1,), single fused call, intermediates in VMEM.
    x = jax.random.normal(k_x, (batch, input_dim), jnp.float32)
    out = jax.block_until_ready(mlp(x))
    ref = mlp.reference(x)
    assert out.shape == (batch, hidden_dims[-1])
    assert jnp.allclose(out, ref, atol=1e-5, rtol=1e-5), "mismatch (small batch)"

    # 2) Single block, M not a multiple of 8 (full-extent block is allowed).
    x_med = jax.random.normal(k_x2, (300, input_dim), jnp.float32)
    out_med = jax.block_until_ready(mlp(x_med))
    assert jnp.allclose(out_med, mlp.reference(x_med), atol=1e-5, rtol=1e-5), \
        "mismatch (M=300)"

    # 3) Multi-block path with balanced tiles + small padded tail
    #    (M=5000 -> 4 blocks of 1256 rows, even count for v7x megacore).
    x_big = jax.random.normal(k_x3, (5000, input_dim), jnp.float32)
    out_big = jax.block_until_ready(mlp(x_big))
    assert out_big.shape == (5000, hidden_dims[-1])
    assert jnp.allclose(out_big, mlp.reference(x_big), atol=1e-5, rtol=1e-5), \
        "mismatch (M=5000, multi-block)"

    # 4) bf16 path: bf16 input/weights/output (halves HBM traffic), loose check.
    mlp_bf16 = MLPPallas(input_dim, hidden_dims=hidden_dims, activation='tanh',
                         matmul_dtype=jnp.bfloat16, key=k_p)
    x_bf16 = x_big[:512].astype(jnp.bfloat16)
    out_bf16 = jax.block_until_ready(mlp_bf16(x_bf16))
    ref_bf16 = mlp_bf16.reference(x_bf16.astype(jnp.float32))
    assert out_bf16.dtype == jnp.bfloat16 and out_bf16.shape == (512, 128)
    assert jnp.allclose(out_bf16.astype(jnp.float32), ref_bf16, atol=0.1), \
        "mismatch (bf16 path)"

    print("KERNEL_OK")
</pallas_src>

<mosaic_0001>
module attributes {stable_mosaic.version = 11 : i64} {
  func.func @_fused_mlp_kernel(%arg0: i32, %arg1: memref<8x32xf32, #tpu.memory_space<vmem>>, %arg2: memref<32x128xf32, #tpu.memory_space<vmem>>, %arg3: memref<1x128xf32, #tpu.memory_space<vmem>>, %arg4: memref<128x128xf32, #tpu.memory_space<vmem>>, %arg5: memref<1x128xf32, #tpu.memory_space<vmem>>, %arg6: memref<8x128xf32, #tpu.memory_space<vmem>>) attributes {dimension_semantics = [#tpu.dimension_semantics<parallel>], iteration_bounds = array<i64: 1>, scalar_prefetch = 0 : i64, scratch_operands = 0 : i64, tpu.core_type = #tpu.core_type<tc>, window_params = [{transform_indices = @transform_0, window_bounds = array<i64: 8, 32>}, {pipeline_mode = #tpu.pipeline_mode<synchronous>, transform_indices = @transform_1, window_bounds = array<i64: 32, 128>}, {pipeline_mode = #tpu.pipeline_mode<synchronous>, transform_indices = @transform_2, window_bounds = array<i64: 1, 128>}, {pipeline_mode = #tpu.pipeline_mode<synchronous>, transform_indices = @transform_3, window_bounds = array<i64: 128, 128>}, {pipeline_mode = #tpu.pipeline_mode<synchronous>, transform_indices = @transform_4, window_bounds = array<i64: 1, 128>}, {transform_indices = @transform_5, window_bounds = array<i64: 8, 128>}]} {
    %c0 = arith.constant 0 : index
    %c0_0 = arith.constant 0 : index
    %0 = vector.load %arg1[%c0, %c0_0] : memref<8x32xf32, #tpu.memory_space<vmem>>, vector<8x32xf32>
    %c0_1 = arith.constant 0 : index
    %c0_2 = arith.constant 0 : index
    %1 = vector.load %arg2[%c0_1, %c0_2] : memref<32x128xf32, #tpu.memory_space<vmem>>, vector<32x128xf32>
    %c0_3 = arith.constant 0 : index
    %c0_4 = arith.constant 0 : index
    %2 = vector.load %arg3[%c0_3, %c0_4] : memref<1x128xf32, #tpu.memory_space<vmem>>, vector<1x128xf32>
    %cst = arith.constant dense<0.000000e+00> : vector<8x128xf32>
    %3 = tpu.matmul %0, %1, %cst {dimension_numbers = #tpu.dot_dimension_numbers<[1], [0], [0], [1], [0, 0, 1, 1], [], []>} : vector<8x32xf32>, vector<32x128xf32>, vector<8x128xf32> -> vector<8x128xf32>
    %4 = vector.broadcast %2 : vector<1x128xf32> to vector<8x128xf32>
    %5 = arith.addf %3, %4 : vector<8x128xf32>
    %6 = math.tanh %5 : vector<8x128xf32>
    %c0_5 = arith.constant 0 : index
    %c0_6 = arith.constant 0 : index
    %7 = vector.load %arg4[%c0_5, %c0_6] : memref<128x128xf32, #tpu.memory_space<vmem>>, vector<128x128xf32>
    %c0_7 = arith.constant 0 : index
    %c0_8 = arith.constant 0 : index
    %8 = vector.load %arg5[%c0_7, %c0_8] : memref<1x128xf32, #tpu.memory_space<vmem>>, vector<1x128xf32>
    %cst_9 = arith.constant dense<0.000000e+00> : vector<8x128xf32>
    %9 = tpu.matmul %6, %7, %cst_9 {dimension_numbers = #tpu.dot_dimension_numbers<[1], [0], [0], [1], [0, 0, 1, 1], [], []>} : vector<8x128xf32>, vector<128x128xf32>, vector<8x128xf32> -> vector<8x128xf32>
    %10 = vector.broadcast %8 : vector<1x128xf32> to vector<8x128xf32>
    %11 = arith.addf %9, %10 : vector<8x128xf32>
    %12 = math.tanh %11 : vector<8x128xf32>
    %c0_10 = arith.constant 0 : index
    %c0_11 = arith.constant 0 : index
    %13 = vector.load %arg6[%c0_10, %c0_11] : memref<8x128xf32, #tpu.memory_space<vmem>>, vector<8x128xf32>
    tpu.vector_store %arg6[%c0_10, %c0_11], %12 {strides = array<i32>} : memref<8x128xf32, #tpu.memory_space<vmem>>, vector<8x128xf32>,
    return
  }
  func.func @transform_0(%arg0: i32) -> (i32, i32) {
    %c0_i32 = arith.constant 0 : i32
    %c0_i32_0 = arith.constant 0 : i32
    return %arg0, %c0_i32 : i32, i32
  }
  func.func @transform_1(%arg0: i32) -> (i32, i32) {
    %c0_i32 = arith.constant 0 : i32
    %c0_i32_0 = arith.constant 0 : i32
    %c0_i32_1 = arith.constant 0 : i32
    return %c0_i32, %c0_i32_0 : i32, i32
  }
  func.func @transform_2(%arg0: i32) -> (i32, i32) {
    %c0_i32 = arith.constant 0 : i32
    %c0_i32_0 = arith.constant 0 : i32
    %c0_i32_1 = arith.constant 0 : i32
    return %c0_i32, %c0_i32_0 : i32, i32
  }
  func.func @transform_3(%arg0: i32) -> (i32, i32) {
    %c0_i32 = arith.constant 0 : i32
    %c0_i32_0 = arith.constant 0 : i32
    %c0_i32_1 = arith.constant 0 : i32
    return %c0_i32, %c0_i32_0 : i32, i32
  }
  func.func @transform_4(%arg0: i32) -> (i32, i32) {
    %c0_i32 = arith.constant 0 : i32
    %c0_i32_0 = arith.constant 0 : i32
    %c0_i32_1 = arith.constant 0 : i32
    return %c0_i32, %c0_i32_0 : i32, i32
  }
  func.func @transform_5(%arg0: i32) -> (i32, i32) {
    %c0_i32 = arith.constant 0 : i32
    %c0_i32_0 = arith.constant 0 : i32
    return %arg0, %c0_i32 : i32, i32
  }
}

</mosaic_0001>

<bundles_post_ra>
// kernel: tpu_custom_call.1
= control target key start
LH: loop header
LB: loop body
LE: loop exit
PB: predicated region body
PF: predicated region fallthrough
CT: control target
= control target key end

     0   :  { %10 = vsyncpa [#allocation3], 0  ;;  %s565_s0 = inlined_call_operand.hbm [shape: f32[8,32], index: 0, kind: input, shape index: {}]   ;;  %s566_s1 = inlined_call_operand.hbm [shape: f32[32,128], index: 1, kind: input, shape index: {}]   ;;  %s567_s2 = inlined_call_operand.vmem [shape: f32[1,128], index: 2, kind: input, shape index: {}]   ;;  %s568_s3 = inlined_call_operand.hbm [shape: f32[128,128], index: 3, kind: input, shape index: {}]   ;;  %s569_s4 = inlined_call_operand.vmem [shape: f32[1,128], index: 4, kind: input, shape index: {}]   ;;  %s570_s5 = inlined_call_operand.hbm [shape: f32[8,128], index: 5, kind: output, shape index: {}]  }
   0x1   :  { %11 = vsyncpa [#allocation6], 0 }
   0x2   :  { %12 = vsyncpa [#allocation4], 0  ;;  %s466_s18 = smov [#allocation5]   ;;  %s372_s22 = scalar_lea.hbm %s566_s1, 512 }
   0x3   :  { %s28_s19 = sshll.u32 %s466_s18, 4  ;;  %p373_p0 = scmp.ne.s32.totalorder %s566_s1, %s372_s22  ;;  %s29_s19 = int_to_ptr.vmem [resolvable:$true] %s28_s19 }
   0x4   :  { %p376_p1 = scmp.lt.u32.totalorder %s372_s22, %s566_s1 }
   0x6   :  { %p378_p2 = pnand %p376_p1, %p373_p0 }
   0x8   :  { %381 = shalt.err (!%p378_p2)
}
   0x9   :  { %s382_s27 = scalar_lea.vmem %s29_s19, 512  ;;  %p387_p4 = scmp.lt.s32.totalorder %s29_s19, %s29_s19 }
   0xa   :  { %p383_p3 = scmp.ne.s32.totalorder %s29_s19, %s382_s27  ;;  %p388_p5 = scmp.lt.s32.totalorder %s382_s27, %s382_s27 }
   0xc   :  { %p389_p6 = por %p388_p5, %p387_p4 }
   0xe   :  { %p390_p7 = pnand %p389_p6, %p383_p3 }
  0x10   :  { %393 = shalt.err (!%p390_p7)
}
  0x11   :  { %s467_s28 = smov 128   ;;  %s468_s29 = smov 8  }
  0x12   :  { %34 = dma.hbm_to_vmem [thread:$0]  %s566_s1, 512, %s29_s19, [#allocation6], %s467_s28, %s467_s28, %s468_s29  }
  0x13   :  { %s469_s7 = smov [#allocation2]   ;;  %s470_s9 = smov [#allocation7]  }
  0x14   :  { %s19_s8 = sshll.u32 %s469_s7, 4  ;;  %s42_s10 = sshll.u32 %s470_s9, 4  ;;  %s20_s8 = int_to_ptr.vmem [resolvable:$true] %s19_s8  ;;  %s43_s10 = int_to_ptr.vmem [resolvable:$true] %s42_s10 }
  0x15   :  { %s394_s13 = scalar_lea.hbm %s565_s0, 128 }
  0x16   :  { %p395_p8 = scmp.ne.s32.totalorder %s565_s0, %s394_s13  ;;  %p398_p9 = scmp.lt.u32.totalorder %s394_s13, %s565_s0 }
  0x18   :  { %p400_p10 = pnand %p398_p9, %p395_p8 }
  0x1a   :  { %403 = shalt.err (!%p400_p10)
}
  0x1b   :  { %s404_s1 = scalar_lea.vmem %s20_s8, 128  ;;  %p409_p12 = scmp.lt.s32.totalorder %s20_s8, %s20_s8 }
  0x1c   :  { %p405_p11 = scmp.ne.s32.totalorder %s20_s8, %s404_s1  ;;  %p410_p13 = scmp.lt.s32.totalorder %s404_s1, %s404_s1 }
  0x1e   :  { %p411_p0 = por %p410_p13, %p409_p12 }
  0x20   :  { %p412_p1 = pnand %p411_p0, %p405_p11 }
  0x22   :  { %415 = shalt.err (!%p412_p1)
}
  0x23   :  { %22 = dma.hbm_to_vmem [thread:$0]  %s565_s0, 128, %s20_s8, [#allocation3]  }
  0x24   :  { %s416_s22 = scalar_lea.hbm %s568_s3, 2048 }
  0x25   :  { %p417_p2 = scmp.ne.s32.totalorder %s568_s3, %s416_s22  ;;  %p420_p3 = scmp.lt.u32.totalorder %s416_s22, %s568_s3 }
  0x27   :  { %p422_p4 = pnand %p420_p3, %p417_p2 }
  0x29   :  { %425 = shalt.err (!%p422_p4)
}
  0x2a   :  { %s426_s27 = scalar_lea.vmem %s43_s10, 2048  ;;  %p431_p6 = scmp.lt.s32.totalorder %s43_s10, %s43_s10 }
  0x2b   :  { %p427_p5 = scmp.ne.s32.totalorder %s43_s10, %s426_s27  ;;  %p432_p7 = scmp.lt.s32.totalorder %s426_s27, %s426_s27 }
  0x2d   :  { %p433_p8 = por %p432_p7, %p431_p6 }
  0x2f   :  { %p434_p9 = pnand %p433_p8, %p427_p5 }
  0x31   :  { %437 = shalt.err (!%p434_p9)
}
  0x32   :  { %48 = dma.hbm_to_vmem [thread:$0]  %s568_s3, 2048, %s43_s10, [#allocation6], %s467_s28, %s467_s28, %s468_s29  }
  0x33   :  { %460 = dma.done.wait [#allocation3], 128  }
  0x34   :  { %461 = vsyncadd [#allocation3], 4294967168 }
  0x35   :  { %462 = dma.done.wait [#allocation6], 2560  }
  0x36   :  { %463 = vsyncadd [#allocation6], 4294964736  ;;  %v471_v0 = vmov 0.0|0.0   ;;  %vm472_vm0 = vmmov 0   ;;  %v473_v1 = vmov 0.0   ;;  %v61_v2 = vld [vmem:[#allocation5] sm:$0xff] }
  0x37   :  { %329 = vmatprep.subr.bf16.mxu0 %v471_v0  ;;  %291 = vmatprep.mubr.msk.f32.mxu0 %vm472_vm0, %v473_v1  ;;  %v62_v3 = vld [vmem:[#allocation5 + $0x8] sm:$0xff]  ;;  %v63_v4 = vld [vmem:[#allocation5 + $0x10] sm:$0xff]  ;;  %v64_v6 = vld [vmem:[#allocation5 + $0x18] sm:$0xff]  ;;  %vm72_vm1 = vcmask 261120   ;;  %s474_s7 = smov [#allocation8]  }
  0x38   :  { %335 = vmatprep.subr.bf16.mxu1 %v471_v0  ;;  %326 = vmatprep.mubr.msk.f32.mxu1 %vm472_vm0, %v473_v1  ;;  %v330_v5 = vpack.c.bf16 %v62_v3, %v61_v2  ;;  %v147_v7 = vld [vmem:[#allocation7] sm:$0xff]  ;;  %v148_v8 = vld [vmem:[#allocation7 + $0x8] sm:$0xff]  ;;  %v149_v9 = vld [vmem:[#allocation7 + $0x10] sm:$0xff]  ;;  %v333_v11 = vpack.c.bf16 %v64_v6, %v63_v4  ;;  %s248_s8 = sshll.u32 %s474_s7, 4  ;;  %s249_s8 = int_to_ptr.vmem [resolvable:$true] %s248_s8 }
  0x39   :  { %v150_v10 = vld [vmem:[#allocation7 + $0x18] sm:$0xff]  ;;  %v336_v12 = vpack.c.bf16 %v148_v8, %v147_v7  ;;  %v151_v14 = vld [vmem:[#allocation7 + $0x20] sm:$0xff]  ;;  %v152_v15 = vld [vmem:[#allocation7 + $0x28] sm:$0xff]  ;;  %p443_p11 = scmp.lt.s32.totalorder %s249_s8, %s249_s8 }
  0x3a   :  { %331 = vmatpush3.bf16.msra.mxu0 %v330_v5  ;;  %v339_v13 = vpack.c.bf16 %v150_v10, %v149_v9  ;;  %v60_v16 = vld [vmem:[#allocation2] sm:$0xff]  ;;  %v342_v17 = vpack.c.bf16 %v152_v15, %v151_v14  ;;  %v153_v18 = vld [vmem:[#allocation7 + $0x30] sm:$0xff]  ;;  %v155_v21 = vld [vmem:[#allocation7 + $0x40] sm:$0xff] }
  0x3b   :  { %332 = vmatprep.subr.bf16.mxu0 %v471_v0  ;;  %337 = vmatpush3.bf16.msra.mxu1 %v336_v12  ;;  %v154_v19 = vld [vmem:[#allocation7 + $0x38] sm:$0xff]  ;;  %v156_v22 = vld [vmem:[#allocation7 + $0x48] sm:$0xff]  ;;  %v157_v24 = vld [vmem:[#allocation7 + $0x50] sm:$0xff] }
  0x3c   :  { %338 = vmatprep.subr.bf16.mxu1 %v471_v0  ;;  %v345_v20 = vpack.c.bf16 %v154_v19, %v153_v18  ;;  %v348_v23 = vpack.c.bf16 %v156_v22, %v155_v21  ;;  %v158_v25 = vld [vmem:[#allocation7 + $0x58] sm:$0xff]  ;;  %v159_v27 = vld [vmem:[#allocation7 + $0x60] sm:$0xff]  ;;  %v160_v28 = vld [vmem:[#allocation7 + $0x68] sm:$0xff] }
  0x3d   :  { %v351_v26 = vpack.c.bf16 %v158_v25, %v157_v24  ;;  %v354_v29 = vpack.c.bf16 %v160_v28, %v159_v27  ;;  %v161_v30 = vld [vmem:[#allocation7 + $0x70] sm:$0xff]  ;;  %v162_v31 = vld [vmem:[#allocation7 + $0x78] sm:$0xff] }
  0x3e   :  { %334 = vmatpush3.bf16.msra.mxu0 %v333_v11  ;;  %v357_v32 = vpack.c.bf16 %v162_v31, %v161_v30  ;;  %v258_v33 = vld [vmem:[%s567_s2] ss:$0 sm:$0xff]  ;;  %s438_s2 = scalar_lea.vmem %s249_s8, 128 }
  0x3f   :  { %340 = vmatpush3.bf16.msra.mxu1 %v339_v13  ;;  %v260_v38 = vld [vmem:[%s569_s4] ss:$0 sm:$0xff]  ;;  %p439_p10 = scmp.ne.s32.totalorder %s249_s8, %s438_s2  ;;  %p444_p12 = scmp.lt.s32.totalorder %s438_s2, %s438_s2 }
  0x40   :  { %341 = vmatprep.subr.bf16.mxu1 %v471_v0 }
  0x41   :  { %292 = vmatmul.mubr.msk.f32.vlgmr.msra.gmra.mrb[0].mxu0 %vm72_vm1, %v60_v16  ;;  %p445_p13 = por %p444_p12, %p443_p11 }
  0x43   :  { %343 = vmatpush3.bf16.msra.mxu1 %v342_v17  ;;  %p446_p0 = pnand %p445_p13, %p439_p10 }
  0x44   :  { %344 = vmatprep.subr.bf16.mxu1 %v471_v0 }
  0x47   :  { %346 = vmatpush3.bf16.msra.mxu1 %v345_v20 }
  0x48   :  { %347 = vmatprep.subr.bf16.mxu1 %v471_v0 }
  0x4b   :  { %349 = vmatpush3.bf16.msra.mxu1 %v348_v23 }
  0x4c   :  { %350 = vmatprep.subr.bf16.mxu1 %v471_v0 }
  0x4f   :  { %352 = vmatpush3.bf16.msra.mxu1 %v351_v26 }
  0x50   :  { %353 = vmatprep.subr.bf16.mxu1 %v471_v0 }
  0x53   :  { %355 = vmatpush3.bf16.msra.mxu1 %v354_v29 }
  0x54   :  { %356 = vmatprep.subr.bf16.mxu1 %v471_v0 }
  0x57   :  { %358 = vmatpush3.bf16.msra.mxu1 %v357_v32 }
 0x114   :  { %v142_v34 = vpop.f32.mrb[0].mxu0 }
 0x115   :  { %v143_v35 = vadd.f32 %v258_v33, %v142_v34  ;;  %v293_v36 = vpop.f32.mrb[1].mxu0 }
 0x117   :  { %368 = vtanh.f32 %v143_v35 }
 0x121   :  { %v369_v37 = vpop.eup %368 }
 0x122   :  { %327 = vmatmul.mubr.f32.vlgmr.msra.gmra.mrb[0].mxu1 %v369_v37 }
 0x1f5   :  { %v236_v39 = vpop.f32.mrb[0].mxu1 }
 0x1f6   :  { %v237_v40 = vadd.f32 %v260_v38, %v236_v39  ;;  %v328_v41 = vpop.f32.mrb[1].mxu1 }
 0x1f8   :  { %370 = vtanh.f32 %v237_v40 }
 0x202   :  { %v371_v42 = vpop.eup %370 }
 0x203   :  { %241 = vst [vmem:[#allocation8] sm:$0xff] %v371_v42 }
 0x204   :  { %449 = shalt.err (!%p446_p0)
}
 0x205   :  { %s450_s4 = scalar_lea.hbm %s570_s5, 128 }
 0x206   :  { %p451_p1 = scmp.ne.s32.totalorder %s570_s5, %s450_s4  ;;  %p454_p2 = scmp.lt.u32.totalorder %s450_s4, %s570_s5 }
 0x208   :  { %p456_p3 = pnand %p454_p2, %p451_p1 }
 0x20a   :  { %459 = shalt.err (!%p456_p3)
}
 0x20b   :  { %251 = dma.vmem_to_hbm [thread:$0]  %s249_s8, 128, %s570_s5, [#allocation4]  }
 0x20c   :  { %464 = dma.done.wait [#allocation4], 128  }
 0x20d   :  { %465 = vsyncadd [#allocation4], 4294967168 }
 0x20e   :  { %255 = vsyncpa [#allocation3], 1 }
 0x20f   :  { %256 = vsyncpa [#allocation6], 1 }
 0x210   :  { %257 = vsyncpa [#allocation4], 1 }

</bundles_post_ra>
